<compile_context>
chip_gen: v7x
topology: tpu7x:2x2x1
jax: 0.10.0
libtpu: 0.0.40
codegen_flags: <defaults>
</compile_context>

<pallas_src>
import functools

import jax
import jax.numpy as jnp
from jax import lax
from jax.experimental import pallas as pl
from jax.experimental.pallas import tpu as pltpu


def _clap_lse_kernel(inv_temp_ref,                       # SMEM: [1/logit_scale]
                     za_i_ref, zt_i_ref, zt_j_ref, za_j_ref,   # VMEM blocks
                     out_a_ref, out_t_ref,                # per-row LSE (tm, 1)
                     m_a, s_a, m_t, s_t,                  # VMEM scratch (tm, 1)
                     *, fixed_max):
    j = pl.program_id(1)
    nj = pl.num_programs(1)

    # Contract on the last dim of both operands: MXU in native orientation,
    # no operand transpose.  Inputs already normalized / scaled / cast.
    dn = (((1,), (1,)), ((), ()))
    tile_a = lax.dot_general(za_i_ref[...], zt_j_ref[...], dn,
                             preferred_element_type=jnp.float32)  # sim  [i, j]
    tile_t = lax.dot_general(zt_i_ref[...], za_j_ref[...], dn,
                             preferred_element_type=jnp.float32)  # sim.T[i, j]

    if fixed_max:
        # Rows are L2-normalized and z_a carries 1/temperature, so every logit
        # is bounded by inv_temp -> use it as a constant max.  No per-tile max
        # reduce, no rescale, no cross-iteration dependence on m.
        m = inv_temp_ref[0]

        @pl.when(j == 0)
        def _():
            s_a[...] = jnp.zeros_like(s_a)
            s_t[...] = jnp.zeros_like(s_t)

        s_a[...] += jnp.sum(jnp.exp(tile_a - m), axis=-1, keepdims=True)
        s_t[...] += jnp.sum(jnp.exp(tile_t - m), axis=-1, keepdims=True)

        @pl.when(j == nj - 1)
        def _():
            out_a_ref[...] = m + jnp.log(s_a[...])
            out_t_ref[...] = m + jnp.log(s_t[...])
    else:
        # Online (flash-style) logsumexp fallback for traced / large inv_temp.
        @pl.when(j == 0)
        def _():
            m_a[...] = jnp.full_like(m_a, -jnp.inf)
            s_a[...] = jnp.zeros_like(s_a)
            m_t[...] = jnp.full_like(m_t, -jnp.inf)
            s_t[...] = jnp.zeros_like(s_t)

        def online_lse(tile, m_ref, s_ref):
            m_old = m_ref[...]
            m_new = jnp.maximum(m_old, jnp.max(tile, axis=-1, keepdims=True))
            s_ref[...] = (s_ref[...] * jnp.exp(m_old - m_new)
                          + jnp.sum(jnp.exp(tile - m_new), axis=-1,
                                    keepdims=True))
            m_ref[...] = m_new

        online_lse(tile_a, m_a, s_a)
        online_lse(tile_t, m_t, s_t)

        @pl.when(j == nj - 1)
        def _():
            out_a_ref[...] = m_a[...] + jnp.log(s_a[...])
            out_t_ref[...] = m_t[...] + jnp.log(s_t[...])


def _pick_tile(batch, target):
    """Largest tile <= target that divides batch; prefer 128- then 8-aligned."""
    target = max(1, min(int(target), batch))
    for align in (128, 8):
        start = (target // align) * align
        for t in range(start, 0, -align):
            if batch % t == 0:
                return t
    return batch  # no aligned divisor; fall back to a single (full) block


def clap_loss(z_a, z_t, logit_scale, *,
              block_rows=256, block_cols=1024,
              matmul_dtype=jnp.bfloat16,
              vmem_limit_bytes=48 * 1024 * 1024):
    """z_a, z_t: (B, D) embeddings. logit_scale: temperature (float or 0-d)."""
    assert z_a.ndim == 2 and z_a.shape == z_t.shape
    B, D = z_a.shape

    inv_temp = 1.0 / jnp.asarray(logit_scale, jnp.float32)

    # Fixed-max LSE is only valid/used when inv_temp is a concrete, moderate
    # positive scalar (otherwise fall back to the online-max path, e.g. for a
    # trainable / traced logit_scale).
    try:
        it = float(inv_temp)
        fixed_max = 0.0 < it < 40.0
    except Exception:
        fixed_max = False

    # ---- Hoisted normalization: F.normalize(x, p=2, dim=1, eps=1e-12) once,
    #      temperature folded into z_a, stored in matmul_dtype.
    eps = jnp.float32(1e-12)
    za32 = z_a.astype(jnp.float32)
    zt32 = z_t.astype(jnp.float32)
    na = jnp.maximum(jnp.sqrt(jnp.sum(za32 * za32, axis=-1, keepdims=True)), eps)
    nt = jnp.maximum(jnp.sqrt(jnp.sum(zt32 * zt32, axis=-1, keepdims=True)), eps)
    za_pre = (za32 * (inv_temp / na)).astype(matmul_dtype)   # carries 1/temp
    zt_pre = (zt32 * (1.0 / nt)).astype(matmul_dtype)

    # diag[i] = sim[i, i] from the same rounded operands: O(B*D) in the wrapper.
    diag = jnp.sum(za_pre.astype(jnp.float32) * zt_pre.astype(jnp.float32),
                   axis=-1)

    # ---- Tile selection: decoupled row/col tiles; >= 2 row blocks for v7x's
    #      two TensorCores; large column tile to amortize per-step overhead.
    row_cap = B // 2 if B >= 16 else B
    tm = _pick_tile(B, min(block_rows, row_cap))
    tn = _pick_tile(B, block_cols)
    grid = (B // tm, B // tn)

    inv_temp_smem = jnp.reshape(inv_temp, (1,))
    out_sd = jax.ShapeDtypeStruct((B, 1), jnp.float32)
    kernel = functools.partial(_clap_lse_kernel, fixed_max=fixed_max)

    lse_a, lse_t = pl.pallas_call(
        kernel,
        out_shape=(out_sd, out_sd),
        grid=grid,
        in_specs=[
            pl.BlockSpec(memory_space=pltpu.MemorySpace.SMEM),   # 1/logit_scale
            pl.BlockSpec((tm, D), lambda i, j: (i, 0)),   # z_a rows i (invariant)
            pl.BlockSpec((tm, D), lambda i, j: (i, 0)),   # z_t rows i (invariant)
            pl.BlockSpec((tn, D), lambda i, j: (j, 0)),   # z_t rows j (streamed)
            pl.BlockSpec((tn, D), lambda i, j: (j, 0)),   # z_a rows j (streamed)
        ],
        out_specs=(
            pl.BlockSpec((tm, 1), lambda i, j: (i, 0)),
            pl.BlockSpec((tm, 1), lambda i, j: (i, 0)),
        ),
        scratch_shapes=[pltpu.VMEM((tm, 1), jnp.float32)] * 4,   # m_a,s_a,m_t,s_t
        compiler_params=pltpu.CompilerParams(
            dimension_semantics=("parallel", "arbitrary"),
            vmem_limit_bytes=vmem_limit_bytes),
    )(inv_temp_smem, za_pre, zt_pre, zt_pre, za_pre)

    loss_a = jnp.mean(lse_a[:, 0] - diag)   # CE audio -> text
    loss_t = jnp.mean(lse_t[:, 0] - diag)   # CE text  -> audio
    total = (loss_a + loss_t) * 0.5
    return {"loss_a": loss_a, "loss_t": loss_t, "total_loss": total}


# ----------------------------- references -----------------------------------

def _reference(z_a, z_t, logit_scale):
    """Pure-JAX reference replicating the PyTorch forward (full f32)."""
    za = z_a / jnp.maximum(jnp.linalg.norm(z_a, axis=1, keepdims=True), 1e-12)
    zt = z_t / jnp.maximum(jnp.linalg.norm(z_t, axis=1, keepdims=True), 1e-12)
    sim = jnp.dot(za, zt.T, precision=lax.Precision.HIGHEST) * (1.0 / logit_scale)
    b = sim.shape[0]
    labels = jnp.arange(b)

    def ce(logits):
        logp = jax.nn.log_softmax(logits, axis=-1)
        return -jnp.mean(logp[jnp.arange(b), labels])

    loss_a = ce(sim)
    loss_t = ce(sim.T)
    return loss_a, loss_t, (loss_a + loss_t) / 2


def _reference_matched(z_a, z_t, logit_scale, matmul_dtype):
    """Numerics-matched reference for the reduced-precision operand path."""
    inv_temp = 1.0 / logit_scale
    na = jnp.maximum(jnp.linalg.norm(z_a, axis=1, keepdims=True), 1e-12)
    nt = jnp.maximum(jnp.linalg.norm(z_t, axis=1, keepdims=True), 1e-12)
    za = (z_a * (inv_temp / na)).astype(matmul_dtype).astype(jnp.float32)
    zt = (z_t * (1.0 / nt)).astype(matmul_dtype).astype(jnp.float32)
    sim = jnp.dot(za, zt.T, precision=lax.Precision.HIGHEST)  # exact f32 acc
    diag = jnp.diagonal(sim)
    loss_a = jnp.mean(jax.nn.logsumexp(sim, axis=1) - diag)
    loss_t = jnp.mean(jax.nn.logsumexp(sim, axis=0) - diag)
    return loss_a, loss_t, 0.5 * (loss_a + loss_t)


if __name__ == "__main__":
    # Module defaults: logit_scale = temperature = 0.1, trainable=False.
    temperature = 0.1

    key = jax.random.PRNGKey(0)
    ka, kt = jax.random.split(key)
    # Small but multi-block: 128-row / 128-col tiles -> 2x2 grid, exercising
    # the cross-column-block accumulation and the parallel row axis.
    B, D = 256, 64
    z_a = jax.random.normal(ka, (B, D), dtype=jnp.float32)
    z_t = jax.random.normal(kt, (B, D), dtype=jnp.float32)

    ref_a, ref_t, ref_total = _reference(z_a, z_t, temperature)
    emu_a, emu_t, emu_total = _reference_matched(z_a, z_t, temperature,
                                                 jnp.bfloat16)

    # 1) Default fast path: bf16 MXU operands, fixed-max LSE, 2x2 grid.
    out = clap_loss(z_a, z_t, temperature, block_rows=128, block_cols=128)
    jax.block_until_ready(out)
    # Semantics vs exact f32 module math (bf16 operand rounding ~1e-3).
    assert jnp.allclose(out["loss_a"], ref_a, atol=2e-2, rtol=2e-2)
    assert jnp.allclose(out["loss_t"], ref_t, atol=2e-2, rtol=2e-2)
    assert jnp.allclose(out["total_loss"], ref_total, atol=2e-2, rtol=2e-2)
    # Tight check against a reference with the same operand rounding.
    assert jnp.allclose(out["loss_a"], emu_a, atol=5e-4, rtol=5e-4)
    assert jnp.allclose(out["loss_t"], emu_t, atol=5e-4, rtol=5e-4)
    assert jnp.allclose(out["total_loss"], emu_total, atol=5e-4, rtol=5e-4)

    # 2) Online-max fallback (traced temperature, as for a trainable
    #    logit_scale): compile + correctness coverage.
    jit_loss = jax.jit(functools.partial(clap_loss, block_rows=128,
                                         block_cols=128))
    out_online = jit_loss(z_a, z_t, jnp.float32(temperature))
    jax.block_until_ready(out_online)
    assert jnp.allclose(out_online["loss_a"], emu_a, atol=5e-4, rtol=5e-4)
    assert jnp.allclose(out_online["loss_t"], emu_t, atol=5e-4, rtol=5e-4)
    assert jnp.allclose(out_online["total_loss"], emu_total,
                        atol=5e-4, rtol=5e-4)

    # 3) f32-operand escape hatch (compile coverage; loose tolerance keeps the
    #    check independent of the backend's default f32 matmul pass count).
    out32 = clap_loss(z_a, z_t, temperature, matmul_dtype=jnp.float32)
    jax.block_until_ready(out32)
    assert jnp.allclose(out32["loss_a"], ref_a, atol=2e-2, rtol=2e-2)
    assert jnp.allclose(out32["loss_t"], ref_t, atol=2e-2, rtol=2e-2)
    assert jnp.allclose(out32["total_loss"], ref_total, atol=2e-2, rtol=2e-2)

    print("KERNEL_OK")
</pallas_src>

<mosaic_0001>
module attributes {stable_mosaic.version = 11 : i64} {
  func.func @_clap_lse_kernel(%arg0: i32, %arg1: i32, %arg2: memref<1xf32, #tpu.memory_space<smem>>, %arg3: memref<128x64xbf16, #tpu.memory_space<vmem>>, %arg4: memref<128x64xbf16, #tpu.memory_space<vmem>>, %arg5: memref<128x64xbf16, #tpu.memory_space<vmem>>, %arg6: memref<128x64xbf16, #tpu.memory_space<vmem>>, %arg7: memref<128x1xf32, #tpu.memory_space<vmem>>, %arg8: memref<128x1xf32, #tpu.memory_space<vmem>>, %arg9: memref<128x1xf32, #tpu.memory_space<vmem>>, %arg10: memref<128x1xf32, #tpu.memory_space<vmem>>, %arg11: memref<128x1xf32, #tpu.memory_space<vmem>>, %arg12: memref<128x1xf32, #tpu.memory_space<vmem>>) attributes {dimension_semantics = [#tpu.dimension_semantics<parallel>, #tpu.dimension_semantics<arbitrary>], iteration_bounds = array<i64: 2, 2>, scalar_prefetch = 0 : i64, scratch_operands = 4 : i64, tpu.core_type = #tpu.core_type<tc>, window_params = [{transform_indices = @transform_0, window_bounds = array<i64: 1>}, {transform_indices = @transform_1, window_bounds = array<i64: 128, 64>}, {transform_indices = @transform_2, window_bounds = array<i64: 128, 64>}, {transform_indices = @transform_3, window_bounds = array<i64: 128, 64>}, {transform_indices = @transform_4, window_bounds = array<i64: 128, 64>}, {transform_indices = @transform_5, window_bounds = array<i64: 128, 1>}, {transform_indices = @transform_6, window_bounds = array<i64: 128, 1>}]} {
    %c0 = arith.constant 0 : index
    %c0_0 = arith.constant 0 : index
    %0 = vector.load %arg3[%c0, %c0_0] : memref<128x64xbf16, #tpu.memory_space<vmem>>, vector<128x64xbf16>
    %c0_1 = arith.constant 0 : index
    %c0_2 = arith.constant 0 : index
    %1 = vector.load %arg5[%c0_1, %c0_2] : memref<128x64xbf16, #tpu.memory_space<vmem>>, vector<128x64xbf16>
    %cst = arith.constant dense<0.000000e+00> : vector<128x128xf32>
    %2 = tpu.matmul %0, %1, %cst {dimension_numbers = #tpu.dot_dimension_numbers<[1], [1], [0], [0], [0, 0, 1, 0], [], []>} : vector<128x64xbf16>, vector<128x64xbf16>, vector<128x128xf32> -> vector<128x128xf32>
    %c0_3 = arith.constant 0 : index
    %c0_4 = arith.constant 0 : index
    %3 = vector.load %arg4[%c0_3, %c0_4] : memref<128x64xbf16, #tpu.memory_space<vmem>>, vector<128x64xbf16>
    %c0_5 = arith.constant 0 : index
    %c0_6 = arith.constant 0 : index
    %4 = vector.load %arg6[%c0_5, %c0_6] : memref<128x64xbf16, #tpu.memory_space<vmem>>, vector<128x64xbf16>
    %cst_7 = arith.constant dense<0.000000e+00> : vector<128x128xf32>
    %5 = tpu.matmul %3, %4, %cst_7 {dimension_numbers = #tpu.dot_dimension_numbers<[1], [1], [0], [0], [0, 0, 1, 0], [], []>} : vector<128x64xbf16>, vector<128x64xbf16>, vector<128x128xf32> -> vector<128x128xf32>
    %c0_8 = arith.constant 0 : index
    %6 = memref.load %arg2[%c0_8] : memref<1xf32, #tpu.memory_space<smem>>
    %c0_i32 = arith.constant 0 : i32
    %7 = arith.cmpi eq, %arg1, %c0_i32 : i32
    %8 = arith.extui %7 : i1 to i32
    %c0_i32_9 = arith.constant 0 : i32
    %9 = arith.cmpi ne, %8, %c0_i32_9 : i32
    scf.if %9 {
      %cst_21 = arith.constant 0.000000e+00 : f32
      %29 = vector.broadcast %cst_21 : f32 to vector<128x1xf32>
      %c0_22 = arith.constant 0 : index
      %c0_23 = arith.constant 0 : index
      %30 = vector.load %arg10[%c0_22, %c0_23] : memref<128x1xf32, #tpu.memory_space<vmem>>, vector<128x1xf32>
      tpu.vector_store %arg10[%c0_22, %c0_23], %29 {strides = array<i32>} : memref<128x1xf32, #tpu.memory_space<vmem>>, vector<128x1xf32>,
      %cst_24 = arith.constant 0.000000e+00 : f32
      %31 = vector.broadcast %cst_24 : f32 to vector<128x1xf32>
      %c0_25 = arith.constant 0 : index
      %c0_26 = arith.constant 0 : index
      %32 = vector.load %arg12[%c0_25, %c0_26] : memref<128x1xf32, #tpu.memory_space<vmem>>, vector<128x1xf32>
      tpu.vector_store %arg12[%c0_25, %c0_26], %31 {strides = array<i32>} : memref<128x1xf32, #tpu.memory_space<vmem>>, vector<128x1xf32>,
    } else {
    }
    %c0_10 = arith.constant 0 : index
    %c0_11 = arith.constant 0 : index
    %10 = vector.load %arg10[%c0_10, %c0_11] : memref<128x1xf32, #tpu.memory_space<vmem>>, vector<128x1xf32>
    %11 = vector.broadcast %6 : f32 to vector<128x128xf32>
    %12 = arith.subf %2, %11 : vector<128x128xf32>
    %13 = math.exp %12 : vector<128x128xf32>
    %cst_12 = arith.constant dense<0.000000e+00> : vector<128xf32>
    %14 = vector.multi_reduction <add>, %13, %cst_12 [1] : vector<128x128xf32> to vector<128xf32>
    %15 = vector.shape_cast %14 : vector<128xf32> to vector<128x1xf32>
    %16 = arith.addf %10, %15 : vector<128x1xf32>
    %c0_13 = arith.constant 0 : index
    %c0_14 = arith.constant 0 : index
    %17 = vector.load %arg10[%c0_13, %c0_14] : memref<128x1xf32, #tpu.memory_space<vmem>>, vector<128x1xf32>
    tpu.vector_store %arg10[%c0_13, %c0_14], %16 {strides = array<i32>} : memref<128x1xf32, #tpu.memory_space<vmem>>, vector<128x1xf32>,
    %c0_15 = arith.constant 0 : index
    %c0_16 = arith.constant 0 : index
    %18 = vector.load %arg12[%c0_15, %c0_16] : memref<128x1xf32, #tpu.memory_space<vmem>>, vector<128x1xf32>
    %19 = vector.broadcast %6 : f32 to vector<128x128xf32>
    %20 = arith.subf %5, %19 : vector<128x128xf32>
    %21 = math.exp %20 : vector<128x128xf32>
    %cst_17 = arith.constant dense<0.000000e+00> : vector<128xf32>
    %22 = vector.multi_reduction <add>, %21, %cst_17 [1] : vector<128x128xf32> to vector<128xf32>
    %23 = vector.shape_cast %22 : vector<128xf32> to vector<128x1xf32>
    %24 = arith.addf %18, %23 : vector<128x1xf32>
    %c0_18 = arith.constant 0 : index
    %c0_19 = arith.constant 0 : index
    %25 = vector.load %arg12[%c0_18, %c0_19] : memref<128x1xf32, #tpu.memory_space<vmem>>, vector<128x1xf32>
    tpu.vector_store %arg12[%c0_18, %c0_19], %24 {strides = array<i32>} : memref<128x1xf32, #tpu.memory_space<vmem>>, vector<128x1xf32>,
    %c1_i32 = arith.constant 1 : i32
    %26 = arith.cmpi eq, %arg1, %c1_i32 : i32
    %27 = arith.extui %26 : i1 to i32
    %c0_i32_20 = arith.constant 0 : i32
    %28 = arith.cmpi ne, %27, %c0_i32_20 : i32
    scf.if %28 {
      %c0_21 = arith.constant 0 : index
      %c0_22 = arith.constant 0 : index
      %29 = vector.load %arg10[%c0_21, %c0_22] : memref<128x1xf32, #tpu.memory_space<vmem>>, vector<128x1xf32>
      %30 = math.log %29 : vector<128x1xf32>
      %31 = vector.broadcast %6 : f32 to vector<128x1xf32>
      %32 = arith.addf %31, %30 : vector<128x1xf32>
      %c0_23 = arith.constant 0 : index
      %c0_24 = arith.constant 0 : index
      %33 = vector.load %arg7[%c0_23, %c0_24] : memref<128x1xf32, #tpu.memory_space<vmem>>, vector<128x1xf32>
      tpu.vector_store %arg7[%c0_23, %c0_24], %32 {strides = array<i32>} : memref<128x1xf32, #tpu.memory_space<vmem>>, vector<128x1xf32>,
      %c0_25 = arith.constant 0 : index
      %c0_26 = arith.constant 0 : index
      %34 = vector.load %arg12[%c0_25, %c0_26] : memref<128x1xf32, #tpu.memory_space<vmem>>, vector<128x1xf32>
      %35 = math.log %34 : vector<128x1xf32>
      %36 = vector.broadcast %6 : f32 to vector<128x1xf32>
      %37 = arith.addf %36, %35 : vector<128x1xf32>
      %c0_27 = arith.constant 0 : index
      %c0_28 = arith.constant 0 : index
      %38 = vector.load %arg8[%c0_27, %c0_28] : memref<128x1xf32, #tpu.memory_space<vmem>>, vector<128x1xf32>
      tpu.vector_store %arg8[%c0_27, %c0_28], %37 {strides = array<i32>} : memref<128x1xf32, #tpu.memory_space<vmem>>, vector<128x1xf32>,
    } else {
    }
    return
  }
  func.func @transform_0(%arg0: i32, %arg1: i32) -> i32 {
    %c0_i32 = arith.constant 0 : i32
    %c0_i32_0 = arith.constant 0 : i32
    return %c0_i32 : i32
  }
  func.func @transform_1(%arg0: i32, %arg1: i32) -> (i32, i32) {
    %c0_i32 = arith.constant 0 : i32
    %c0_i32_0 = arith.constant 0 : i32
    return %arg0, %c0_i32 : i32, i32
  }
  func.func @transform_2(%arg0: i32, %arg1: i32) -> (i32, i32) {
    %c0_i32 = arith.constant 0 : i32
    %c0_i32_0 = arith.constant 0 : i32
    return %arg0, %c0_i32 : i32, i32
  }
  func.func @transform_3(%arg0: i32, %arg1: i32) -> (i32, i32) {
    %c0_i32 = arith.constant 0 : i32
    %c0_i32_0 = arith.constant 0 : i32
    return %arg1, %c0_i32 : i32, i32
  }
  func.func @transform_4(%arg0: i32, %arg1: i32) -> (i32, i32) {
    %c0_i32 = arith.constant 0 : i32
    %c0_i32_0 = arith.constant 0 : i32
    return %arg1, %c0_i32 : i32, i32
  }
  func.func @transform_5(%arg0: i32, %arg1: i32) -> (i32, i32) {
    %c0_i32 = arith.constant 0 : i32
    %c0_i32_0 = arith.constant 0 : i32
    return %arg0, %c0_i32 : i32, i32
  }
  func.func @transform_6(%arg0: i32, %arg1: i32) -> (i32, i32) {
    %c0_i32 = arith.constant 0 : i32
    %c0_i32_0 = arith.constant 0 : i32
    return %arg0, %c0_i32 : i32, i32
  }
}

</mosaic_0001>

<bundles_post_ra>
// kernel: tpu_custom_call.1
= control target key start
LH: loop header
LB: loop body
LE: loop exit
PB: predicated region body
PF: predicated region fallthrough
CT: control target
= control target key end

     0   :  { %s1923_s23 = smov 0   ;;  %s1925_s24 = smov 0   ;;  %s2380_s0 = inlined_call_operand.<no memory space> [shape: f32[1], index: 0, kind: input, shape index: {}]   ;;  %s2381_s1 = inlined_call_operand.vmem [shape: bf16[256,64], index: 1, kind: input, shape index: {}]   ;;  %s2382_s2 = inlined_call_operand.vmem [shape: bf16[256,64], index: 2, kind: input, shape index: {}]   ;;  %s2383_s3 = inlined_call_operand.vmem [shape: bf16[256,64], index: 3, kind: input, shape index: {}]   ;;  %s2384_s4 = inlined_call_operand.vmem [shape: bf16[256,64], index: 4, kind: input, shape index: {}]   ;;  %s2385_s5 = inlined_call_operand.vmem [shape: f32[256,1], index: 5, kind: output, shape index: {0}]   ;;  %s2386_s6 = inlined_call_operand.vmem [shape: f32[256,1], index: 6, kind: output, shape index: {1}]  }
   0x1   :  { %12 = sst [smem:[#allocation6]] %s2380_s0  ;;  %s1927_s25 = smov 0  }
   0x2   :  { %s1929_s26 = smov 0   ;;  %s1931_s27 = smov 0  }
   0x3 LB: > { %s27_s0 = sadd.s32 1, %s1874_s25  ;;  %s30_s28 = sadd.s32 1, %s1878_s26  ;;  %s1882_s27 = sphi %s1931_s27, %s18_s27   ;;  %s1878_s26 = sphi %s1929_s26, %s2390_s26   ;;  %s1874_s25 = sphi %s1927_s25, %s2389_s25   ;;  %s1870_s24 = sphi %s1925_s24, %s2388_s24   ;;  %s1866_s23 = sphi %s1923_s23, %s2387_s23  }
   0x4   : > { %p28_p0 = scmp.ge.s32.totalorder %s27_s0, 2  ;;  %p1466_p1 = scmp.ge.s32.totalorder %s1882_s27, 1 }
   0x5   : > { %p262_p2 = scmp.lt.s32.totalorder %s1882_s27, 5 }
   0x6   : > { %s2392_s0 = smov (%p28_p0, %s27_s0), 0  ;;  %s2394_s28 = smov (!%p28_p0, %s30_s28), %s1878_s26 }
   0x7   : > { %p263_p3 = pnand %p1466_p1, %p262_p2  ;;  %p32_p4 = scmp.ge.s32.totalorder %s2394_s28, 2 }
   0x8   : > { %s1471_s29 = sshll.u32 (!%p263_p3), %s1866_s23, 4  ;;  %s1467_s30 = sshll.u32 (!%p263_p3), %s1870_s24, 4  ;;  %vm461_vm0 = vcmask (!%p263_p3), 523264  }
   0x9   : > { %s2396_s28 = smov (%p32_p4, %s2394_s28), 0  ;;  %266 = sbr.rel (%p263_p3) target bundleno = 570 (0x23a), region = 40 }
   0xa   : > { %p325_p5 = scmp.lt.s32.totalorder (!%p263_p3), %s1471_s29, 31  ;;  %p313_p6 = scmp.lt.s32.totalorder (!%p263_p3), %s1467_s30, 31 }
   0xb   : > { %p1527_p7 = scmp.ne.s32.totalorder (!%p263_p3), %s1866_s23, 0 }
  0x10   : > { %s2398_s29 = smov (!%p325_p5, %s1471_s29), 31  ;;  %s2400_s30 = smov (!%p313_p6, %s1467_s30), 31 }
  0x11   : > { %s1472_s7 = sshll.u32 %s2398_s29, 2  ;;  %s1476_s14 = sshll.u32 %s2400_s30, 3  ;;  %vm869_vm1 = vcmask (!%p1527_p7), 7168  }
  0x12   : > { %s1961_s10 = scalar_lea.vmem %s2383_s3, %s1472_s7  ;;  %s1966_s13 = scalar_lea.vmem %s2384_s4, %s1472_s7 }
  0x13   : > { %v1684_v0 = vld [vmem:[%s1961_s10] sm:$0xff]   ;;  %v1686_v3 = vld [vmem:[%s1961_s10 + $0x8] sm:$0xff]   ;;  %s1977_s17 = scalar_lea.vmem %s2385_s5, %s1476_s14  ;;  %s1982_s20 = scalar_lea.vmem %s2386_s6, %s1476_s14  ;;  %v1688_v7 = vld [vmem:[%s1961_s10 + $0x10] sm:$0xff]  }
  0x14   : > { %v1685_v1 = vld [vmem:[%s1966_s13] sm:$0xff]   ;;  %1627 = vmatprep.subr.msk.bf16.mxu0 %vm461_vm0, %v1684_v0  ;;  %v487_v2 = vsel %vm461_vm0, %v1684_v0, 0  ;;  %v1687_v5 = vld [vmem:[%s1966_s13 + $0x8] sm:$0xff]   ;;  %v490_v6 = vsel %vm461_vm0, %v1686_v3, 0  ;;  %v1689_v9 = vld [vmem:[%s1966_s13 + $0x10] sm:$0xff]   ;;  %s1468_s21 = sshll.u32 %s2400_s30, 2 }
  0x15   : > { %1635 = vmatprep.subr.msk.bf16.mxu1 %vm461_vm0, %v1685_v1  ;;  %1564 = vmatpush3.bf16.xpose.msra.mxu0 %v487_v2  ;;  %v744_v4 = vsel %vm461_vm0, %v1685_v1, 0  ;;  %v747_v8 = vsel %vm461_vm0, %v1687_v5, 0  ;;  %s1999_s29 = scalar_lea.vmem %s2381_s1, %s1468_s21  ;;  %v1690_v10 = vld [vmem:[%s1961_s10 + $0x18] sm:$0xff]   ;;  %s2005_s9 = scalar_lea.vmem %s2382_s2, %s1468_s21  ;;  %v493_v12 = vsel %vm461_vm0, %v1688_v7, 0  ;;  %v750_v14 = vsel %vm461_vm0, %v1689_v9, 0  ;;  %v1692_v17 = vld [vmem:[%s1961_s10 + $0x20] sm:$0xff]  }
  0x16   : > { %1596 = vmatpush3.bf16.xpose.msra.mxu1 %v744_v4  ;;  %1628 = vmatprep.subr.msk.bf16.mxu0 %vm461_vm0, %v1686_v3  ;;  %v1691_v11 = vld [vmem:[%s1966_s13 + $0x18] sm:$0xff]   ;;  %v1700_v13 = vld [vmem:[%s1999_s29] sm:$0xff]   ;;  %v496_v16 = vsel %vm461_vm0, %v1690_v10, 0  ;;  %v499_v20 = vsel %vm461_vm0, %v1692_v17, 0  ;;  %v1694_v21 = vld [vmem:[%s1961_s10 + $0x28] sm:$0xff]   ;;  %s2070_s30 = sld [smem:[#allocation6]] }
  0x17   : > { %1636 = vmatprep.subr.msk.bf16.mxu1 %vm461_vm0, %v1687_v5  ;;  %v1701_v15 = vld [vmem:[%s2005_s9] sm:$0xff]   ;;  %1579 = vmatprep.mubr.msk.bf16.mxu0 %vm461_vm0, %v1700_v13  ;;  %v753_v18 = vsel %vm461_vm0, %v1691_v11, 0  ;;  %v1695_v23 = vld [vmem:[%s1966_s13 + $0x28] sm:$0xff]   ;;  %v502_v24 = vsel %vm461_vm0, %v1694_v21, 0  ;;  %v1696_v25 = vld [vmem:[%s1961_s10 + $0x30] sm:$0xff]  }
  0x18   : > { %1611 = vmatprep.mubr.msk.bf16.mxu1 %vm461_vm0, %v1701_v15  ;;  %v1693_v19 = vld [vmem:[%s1966_s13 + $0x20] sm:$0xff]   ;;  %v759_v26 = vsel %vm461_vm0, %v1695_v23, 0  ;;  %v1697_v27 = vld [vmem:[%s1966_s13 + $0x30] sm:$0xff]   ;;  %v505_v28 = vsel %vm461_vm0, %v1696_v25, 0  ;;  %v1698_v29 = vld [vmem:[%s1961_s10 + $0x38] sm:$0xff]  }
  0x19   : > { %v756_v22 = vsel %vm461_vm0, %v1693_v19, 0  ;;  %v762_v30 = vsel %vm461_vm0, %v1697_v27, 0  ;;  %v1699_v31 = vld [vmem:[%s1966_s13 + $0x38] sm:$0xff]   ;;  %v508_v32 = vsel %vm461_vm0, %v1698_v29, 0  ;;  %v1702_v34 = vld [vmem:[%s1999_s29 + $0x8] sm:$0xff]   ;;  %v1704_v36 = vld [vmem:[%s1999_s29 + $0x10] sm:$0xff]  }
  0x1a   : > { %v765_v33 = vsel %vm461_vm0, %v1699_v31, 0  ;;  %v1703_v35 = vld [vmem:[%s2005_s9 + $0x8] sm:$0xff]   ;;  %v1705_v37 = vld [vmem:[%s2005_s9 + $0x10] sm:$0xff]   ;;  %v1706_v38 = vld [vmem:[%s1999_s29 + $0x18] sm:$0xff]  }
  0x1b   : > { %v1707_v39 = vld [vmem:[%s2005_s9 + $0x18] sm:$0xff]   ;;  %v1708_v40 = vld [vmem:[%s1999_s29 + $0x20] sm:$0xff]   ;;  %v1710_v42 = vld [vmem:[%s1999_s29 + $0x28] sm:$0xff]  }
  0x1c   : > { %v1709_v41 = vld [vmem:[%s2005_s9 + $0x20] sm:$0xff]   ;;  %v1711_v43 = vld [vmem:[%s2005_s9 + $0x28] sm:$0xff]   ;;  %v1712_v44 = vld [vmem:[%s1999_s29 + $0x30] sm:$0xff]  }
  0x1d   : > { %1566 = vmatpush3.bf16.xpose.msra.mxu0 %v490_v6  ;;  %v1713_v45 = vld [vmem:[%s2005_s9 + $0x30] sm:$0xff]   ;;  %v1714_v46 = vld [vmem:[%s1999_s29 + $0x38] sm:$0xff]  }
  0x1e   : > { %1598 = vmatpush3.bf16.xpose.msra.mxu1 %v747_v8  ;;  %1629 = vmatprep.subr.msk.bf16.mxu0 %vm461_vm0, %v1688_v7  ;;  %v1715_v47 = vld [vmem:[%s2005_s9 + $0x38] sm:$0xff]  }
  0x1f   : > { %1637 = vmatprep.subr.msk.bf16.mxu1 %vm461_vm0, %v1689_v9 }
  0x25   : > { %1568 = vmatpush3.bf16.xpose.msra.mxu0 %v493_v12 }
  0x26   : > { %1600 = vmatpush3.bf16.xpose.msra.mxu1 %v750_v14  ;;  %1630 = vmatprep.subr.msk.bf16.mxu0 %vm461_vm0, %v1690_v10 }
  0x27   : > { %1638 = vmatprep.subr.msk.bf16.mxu1 %vm461_vm0, %v1691_v11 }
  0x2d   : > { %1570 = vmatpush3.bf16.xpose.msra.mxu0 %v496_v16  ;;  %v1884_v16 = vmov (!%p1527_p7), 0.0  }
  0x2e   : > { %1602 = vmatpush3.bf16.xpose.msra.mxu1 %v753_v18  ;;  %1631 = vmatprep.subr.msk.bf16.mxu0 %vm461_vm0, %v1692_v17  ;;  %870 = vst.msk [vmem:[#allocation3] sm:$0xff] (!%p1527_p7), %vm869_vm1, %v1884_v16  ;;  %871 = vst.msk [vmem:[#allocation3 + $0x8] sm:$0xff] (!%p1527_p7), %vm869_vm1, %v1884_v16 }
  0x2f   : > { %1639 = vmatprep.subr.msk.bf16.mxu1 %vm461_vm0, %v1693_v19  ;;  %872 = vst.msk [vmem:[#allocation3 + $0x10] sm:$0xff] (!%p1527_p7), %vm869_vm1, %v1884_v16  ;;  %873 = vst.msk [vmem:[#allocation3 + $0x18] sm:$0xff] (!%p1527_p7), %vm869_vm1, %v1884_v16 }
  0x30   : > { %874 = vst.msk [vmem:[#allocation3 + $0x20] sm:$0xff] (!%p1527_p7), %vm869_vm1, %v1884_v16  ;;  %875 = vst.msk [vmem:[#allocation3 + $0x28] sm:$0xff] (!%p1527_p7), %vm869_vm1, %v1884_v16 }
  0x31   : > { %876 = vst.msk [vmem:[#allocation3 + $0x30] sm:$0xff] (!%p1527_p7), %vm869_vm1, %v1884_v16  ;;  %877 = vst.msk [vmem:[#allocation3 + $0x38] sm:$0xff] (!%p1527_p7), %vm869_vm1, %v1884_v16 }
  0x32   : > { %878 = vst.msk [vmem:[#allocation3 + $0x40] sm:$0xff] (!%p1527_p7), %vm869_vm1, %v1884_v16  ;;  %879 = vst.msk [vmem:[#allocation3 + $0x48] sm:$0xff] (!%p1527_p7), %vm869_vm1, %v1884_v16 }
  0x33   : > { %880 = vst.msk [vmem:[#allocation3 + $0x50] sm:$0xff] (!%p1527_p7), %vm869_vm1, %v1884_v16  ;;  %881 = vst.msk [vmem:[#allocation3 + $0x58] sm:$0xff] (!%p1527_p7), %vm869_vm1, %v1884_v16 }
  0x34   : > { %882 = vst.msk [vmem:[#allocation3 + $0x60] sm:$0xff] (!%p1527_p7), %vm869_vm1, %v1884_v16  ;;  %883 = vst.msk [vmem:[#allocation3 + $0x68] sm:$0xff] (!%p1527_p7), %vm869_vm1, %v1884_v16 }
  0x35   : > { %1572 = vmatpush3.bf16.xpose.msra.mxu0 %v499_v20  ;;  %884 = vst.msk [vmem:[#allocation3 + $0x70] sm:$0xff] (!%p1527_p7), %vm869_vm1, %v1884_v16  ;;  %885 = vst.msk [vmem:[#allocation3 + $0x78] sm:$0xff] (!%p1527_p7), %vm869_vm1, %v1884_v16 }
  0x36   : > { %1604 = vmatpush3.bf16.xpose.msra.mxu1 %v756_v22  ;;  %1632 = vmatprep.subr.msk.bf16.mxu0 %vm461_vm0, %v1694_v21  ;;  %886 = vst.msk [vmem:[#allocation5] sm:$0xff] (!%p1527_p7), %vm869_vm1, %v1884_v16  ;;  %887 = vst.msk [vmem:[#allocation5 + $0x8] sm:$0xff] (!%p1527_p7), %vm869_vm1, %v1884_v16 }
  0x37   : > { %1640 = vmatprep.subr.msk.bf16.mxu1 %vm461_vm0, %v1695_v23  ;;  %888 = vst.msk [vmem:[#allocation5 + $0x10] sm:$0xff] (!%p1527_p7), %vm869_vm1, %v1884_v16  ;;  %889 = vst.msk [vmem:[#allocation5 + $0x18] sm:$0xff] (!%p1527_p7), %vm869_vm1, %v1884_v16 }
  0x38   : > { %890 = vst.msk [vmem:[#allocation5 + $0x20] sm:$0xff] (!%p1527_p7), %vm869_vm1, %v1884_v16  ;;  %891 = vst.msk [vmem:[#allocation5 + $0x28] sm:$0xff] (!%p1527_p7), %vm869_vm1, %v1884_v16 }
  0x39   : > { %892 = vst.msk [vmem:[#allocation5 + $0x30] sm:$0xff] (!%p1527_p7), %vm869_vm1, %v1884_v16  ;;  %893 = vst.msk [vmem:[#allocation5 + $0x38] sm:$0xff] (!%p1527_p7), %vm869_vm1, %v1884_v16 }
  0x3a   : > { %894 = vst.msk [vmem:[#allocation5 + $0x40] sm:$0xff] (!%p1527_p7), %vm869_vm1, %v1884_v16  ;;  %895 = vst.msk [vmem:[#allocation5 + $0x48] sm:$0xff] (!%p1527_p7), %vm869_vm1, %v1884_v16 }
  0x3b   : > { %896 = vst.msk [vmem:[#allocation5 + $0x50] sm:$0xff] (!%p1527_p7), %vm869_vm1, %v1884_v16  ;;  %897 = vst.msk [vmem:[#allocation5 + $0x58] sm:$0xff] (!%p1527_p7), %vm869_vm1, %v1884_v16 }
  0x3c   : > { %898 = vst.msk [vmem:[#allocation5 + $0x60] sm:$0xff] (!%p1527_p7), %vm869_vm1, %v1884_v16  ;;  %899 = vst.msk [vmem:[#allocation5 + $0x68] sm:$0xff] (!%p1527_p7), %vm869_vm1, %v1884_v16 }
  0x3d   : > { %1574 = vmatpush3.bf16.xpose.msra.mxu0 %v502_v24  ;;  %900 = vst.msk [vmem:[#allocation5 + $0x70] sm:$0xff] (!%p1527_p7), %vm869_vm1, %v1884_v16  ;;  %901 = vst.msk [vmem:[#allocation5 + $0x78] sm:$0xff] (!%p1527_p7), %vm869_vm1, %v1884_v16 }
  0x3e   : > { %1606 = vmatpush3.bf16.xpose.msra.mxu1 %v759_v26  ;;  %1633 = vmatprep.subr.msk.bf16.mxu0 %vm461_vm0, %v1696_v25 }
  0x3f   : > { %1641 = vmatprep.subr.msk.bf16.mxu1 %vm461_vm0, %v1697_v27 }
  0x45   : > { %1576 = vmatpush3.bf16.xpose.msra.mxu0 %v505_v28 }
  0x46   : > { %1608 = vmatpush3.bf16.xpose.msra.mxu1 %v762_v30  ;;  %1634 = vmatprep.subr.msk.bf16.mxu0 %vm461_vm0, %v1698_v29 }
  0x47   : > { %1642 = vmatprep.subr.msk.bf16.mxu1 %vm461_vm0, %v1699_v31 }
  0x4d   : > { %1578 = vmatpush3.bf16.xpose.msra.mxu0 %v508_v32 }
  0x4e   : > { %1610 = vmatpush3.bf16.xpose.msra.mxu1 %v765_v33 }
  0x54   : > { %1580 = vmatmul.mubr.msk.bf16.vlgmr.msra.gmra.mrb[0].mxu0 %vm461_vm0, %v1702_v34 }
  0x55   : > { %1612 = vmatmul.mubr.msk.bf16.vlgmr.msra.gmra.mrb[0].mxu1 %vm461_vm0, %v1703_v35  ;;  %1583 = vmatprep.mubr.msk.bf16.mxu0 %vm461_vm0, %v1704_v36 }
  0x56   : > { %1615 = vmatprep.mubr.msk.bf16.mxu1 %vm461_vm0, %v1705_v37 }
  0x5c   : > { %1584 = vmatmul.mubr.msk.bf16.gmra.mrb[4].mxu0 %vm461_vm0, %v1706_v38 }
  0x5d   : > { %1616 = vmatmul.mubr.msk.bf16.gmra.mrb[4].mxu1 %vm461_vm0, %v1707_v39  ;;  %1587 = vmatprep.mubr.msk.bf16.mxu0 %vm461_vm0, %v1708_v40 }
  0x5e   : > { %1619 = vmatprep.mubr.msk.bf16.mxu1 %vm461_vm0, %v1709_v41 }
  0x64   : > { %1588 = vmatmul.mubr.msk.bf16.gmra.mrb[8].mxu0 %vm461_vm0, %v1710_v42 }
  0x65   : > { %1620 = vmatmul.mubr.msk.bf16.gmra.mrb[8].mxu1 %vm461_vm0, %v1711_v43  ;;  %1591 = vmatprep.mubr.msk.bf16.mxu0 %vm461_vm0, %v1712_v44 }
  0x66   : > { %1623 = vmatprep.mubr.msk.bf16.mxu1 %vm461_vm0, %v1713_v45 }
  0x6c   : > { %1592 = vmatmul.mubr.msk.bf16.gmra.mrb[12].mxu0 %vm461_vm0, %v1714_v46 }
  0x6d   : > { %1624 = vmatmul.mubr.msk.bf16.gmra.mrb[12].mxu1 %vm461_vm0, %v1715_v47 }
 0x127   : > { %v2072_v48 = vpop.f32.mrb[0].mxu0 }
 0x128   : > { %v2074_v49 = vpop.f32.mrb[0].mxu1  ;;  %v2076_v50 = vpop.f32.mrb[1].mxu0 }
 0x129   : > { %v2078_v51 = vpop.f32.mrb[1].mxu1  ;;  %v2080_v52 = vpop.f32.mrb[2].mxu0 }
 0x12a   : > { %v2082_v53 = vpop.f32.mrb[2].mxu1  ;;  %v2084_v54 = vpop.f32.mrb[3].mxu0 }
 0x12b   : > { %v2086_v55 = vpop.f32.mrb[3].mxu1 }
 0x12f   : > { %v2088_v56 = vpop.f32.mrb[4].mxu0 }
 0x130   : > { %v2090_v57 = vpop.f32.mrb[4].mxu1  ;;  %v2092_v58 = vpop.f32.mrb[5].mxu0 }
 0x131   : > { %v2094_v59 = vpop.f32.mrb[5].mxu1  ;;  %v2096_v60 = vpop.f32.mrb[6].mxu0 }
 0x132   : > { %v2098_v61 = vpop.f32.mrb[6].mxu1  ;;  %v2100_v62 = vpop.f32.mrb[7].mxu0 }
 0x133   : > { %v2102_v63 = vpop.f32.mrb[7].mxu1 }
 0x137   : > { %v2104_v0 = vpop.f32.mrb[8].mxu0 }
 0x138   : > { %v2106_v1 = vpop.f32.mrb[8].mxu1  ;;  %v2108_v2 = vpop.f32.mrb[9].mxu0 }
 0x139   : > { %v2110_v3 = vpop.f32.mrb[9].mxu1  ;;  %v2112_v4 = vpop.f32.mrb[10].mxu0 }
 0x13a   : > { %v2114_v5 = vpop.f32.mrb[10].mxu1  ;;  %v2116_v6 = vpop.f32.mrb[11].mxu0 }
 0x13b   : > { %v2118_v7 = vpop.f32.mrb[11].mxu1 }
 0x13d   : > { %868 = sbr.rel (%p1527_p7) target bundleno = 324 (0x144), region = 44 }
 0x13f   : > { %v2120_v8 = vpop.f32.mrb[12].mxu0 }
 0x140   : > { %v2122_v9 = vpop.f32.mrb[12].mxu1  ;;  %v2124_v10 = vpop.f32.mrb[13].mxu0 }
 0x141   : > { %v2126_v11 = vpop.f32.mrb[13].mxu1  ;;  %v2128_v12 = vpop.f32.mrb[14].mxu0 }
 0x142   : > { %v2130_v13 = vpop.f32.mrb[14].mxu1  ;;  %v2132_v14 = vpop.f32.mrb[15].mxu0 }
 0x143   : > { %v2134_v15 = vpop.f32.mrb[15].mxu1 }
 0x144 PF: > { %v2170_v17 = vstv %s2070_s30  ;;  %vm1015_vm2 = vcmask 7168   ;;  %p1528_p8 = scmp.ne.s32.totalorder %s1866_s23, 1 }
 0x145   : > { %v921_v18 = vsub.f32 %v2072_v48, %v2170_v17  ;;  %v919_v19 = vsub.f32 %v2076_v50, %v2170_v17  ;;  %v922_v20 = vsub.f32 %v2080_v52, %v2170_v17  ;;  %v920_v21 = vsub.f32 %v2084_v54, %v2170_v17 }
 0x146   : > { %v924_v25 = vsub.f32 %v2100_v62, %v2170_v17  ;;  %v923_v27 = vsub.f32 %v2092_v58, %v2170_v17  ;;  %v926_v29 = vsub.f32 %v2096_v60, %v2170_v17  ;;  %v925_v31 = vsub.f32 %v2088_v56, %v2170_v17 }
 0x147   : > { %v939_v22 = vmul.f32 1.442695, %v921_v18  ;;  %v935_v23 = vmul.f32 1.442695, %v919_v19  ;;  %v941_v24 = vmul.f32 1.442695, %v922_v20  ;;  %v928_v33 = vsub.f32 %v2116_v6, %v2170_v17 }
 0x148   : > { %v937_v26 = vmul.f32 1.442695, %v920_v21  ;;  %v945_v28 = vmul.f32 1.442695, %v924_v25  ;;  %v943_v30 = vmul.f32 1.442695, %v923_v27  ;;  %v927_v35 = vsub.f32 %v2108_v2, %v2170_v17 }
 0x149   : > { %1716 = vpow2.f32 %v939_v22  ;;  %v949_v32 = vmul.f32 1.442695, %v926_v29  ;;  %v947_v34 = vmul.f32 1.442695, %v925_v31  ;;  %v953_v37 = vmul.f32 1.442695, %v928_v33 }
 0x14a   : > { %1718 = vpow2.f32 %v935_v23  ;;  %v930_v38 = vsub.f32 %v2112_v4, %v2170_v17  ;;  %v951_v40 = vmul.f32 1.442695, %v927_v35  ;;  %v929_v41 = vsub.f32 %v2104_v0, %v2170_v17 }
 0x14b   : > { %1720 = vpow2.f32 %v941_v24  ;;  %v932_v45 = vsub.f32 %v2132_v14, %v2170_v17  ;;  %v931_v47 = vsub.f32 %v2124_v10, %v2170_v17  ;;  %v934_v54 = vsub.f32 %v2128_v12, %v2170_v17 }
 0x14c   : > { %1722 = vpow2.f32 %v937_v26  ;;  %v957_v44 = vmul.f32 1.442695, %v930_v38  ;;  %v955_v46 = vmul.f32 1.442695, %v929_v41  ;;  %v933_v58 = vsub.f32 %v2120_v8, %v2170_v17 }
 0x14d   : > { %1724 = vpow2.f32 %v945_v28  ;;  %v961_v52 = vmul.f32 1.442695, %v932_v45  ;;  %v959_v56 = vmul.f32 1.442695, %v931_v47  ;;  %v965_v0 = vmul.f32 1.442695, %v934_v54 }
 0x14e   : > { %1726 = vpow2.f32 %v943_v30  ;;  %v1049_v2 = vsub.f32 %v2086_v55, %v2170_v17  ;;  %v963_v4 = vmul.f32 1.442695, %v933_v58  ;;  %v1048_v6 = vsub.f32 %v2078_v51, %v2170_v17  ;;  %v904_v54 = vld [vmem:[#allocation3 + $0x10] sm:$0xff] }
 0x14f   : > { %1728 = vpow2.f32 %v949_v32  ;;  %v1051_v8 = vsub.f32 %v2082_v53, %v2170_v17  ;;  %v1050_v55 = vsub.f32 %v2074_v49, %v2170_v17  ;;  %v1053_v51 = vsub.f32 %v2102_v63, %v2170_v17 }
 0x150   : > { %1730 = vpow2.f32 %v947_v34  ;;  %v1066_v14 = vmul.f32 1.442695, %v1049_v2  ;;  %v1064_v16 = vmul.f32 1.442695, %v1048_v6  ;;  %v1052_v53 = vsub.f32 %v2094_v59, %v2170_v17  ;;  %v905_v2 = vld [vmem:[#allocation3 + $0x18] sm:$0xff] }
 0x151   : > { %1732 = vpow2.f32 %v953_v37  ;;  %v1070_v20 = vmul.f32 1.442695, %v1051_v8  ;;  %v1068_v21 = vmul.f32 1.442695, %v1050_v55  ;;  %v1074_v24 = vmul.f32 1.442695, %v1053_v51 }
 0x152   : > { %1734 = vpow2.f32 %v951_v40  ;;  %v1055_v49 = vsub.f32 %v2098_v61, %v2170_v17  ;;  %v1072_v25 = vmul.f32 1.442695, %v1052_v53  ;;  %v1054_v63 = vsub.f32 %v2090_v57, %v2170_v17  ;;  %v907_v8 = vld [vmem:[#allocation3 + $0x28] sm:$0xff]  ;;  %v909_v51 = vld [vmem:[#allocation3 + $0x38] sm:$0xff] }
 0x153   : > { %v1717_v36 = vpop.eup %1716  ;;  %1736 = vpow2.f32 %v957_v44  ;;  %v1057_v59 = vsub.f32 %v2118_v7, %v2170_v17  ;;  %v1056_v61 = vsub.f32 %v2110_v3, %v2170_v17  ;;  %v1059_v57 = vsub.f32 %v2114_v5, %v2170_v17 }
 0x154   : > { %v1719_v39 = vpop.eup %1718  ;;  %971 = vadd.xlane.f32.xlu1 %v1717_v36  ;;  %1738 = vpow2.f32 %v955_v46  ;;  %v1078_v28 = vmul.f32 1.442695, %v1055_v49  ;;  %v1076_v29 = vmul.f32 1.442695, %v1054_v63  ;;  %v1058_v7 = vsub.f32 %v2106_v1, %v2170_v17  ;;  %v911_v49 = vld [vmem:[#allocation3 + $0x48] sm:$0xff] }
 0x155   : > { %v1721_v42 = vpop.eup %1720  ;;  %967 = vadd.xlane.f32.xlu0 %v1719_v39  ;;  %1740 = vpow2.f32 %v961_v52  ;;  %v1082_v32 = vmul.f32 1.442695, %v1057_v59  ;;  %v1080_v33 = vmul.f32 1.442695, %v1056_v61  ;;  %v1086_v36 = vmul.f32 1.442695, %v1059_v57 }
 0x156   : > { %v1723_v43 = vpop.eup %1722  ;;  %1742 = vpow2.f32 %v959_v56  ;;  %v1061_v3 = vsub.f32 %v2134_v15, %v2170_v17  ;;  %v1084_v37 = vmul.f32 1.442695, %v1058_v7  ;;  %v1060_v5 = vsub.f32 %v2126_v11, %v2170_v17  ;;  %v902_v56 = vld [vmem:[#allocation3] sm:$0xff]  ;;  %v913_v59 = vld [vmem:[#allocation3 + $0x58] sm:$0xff]  ;;  %v915_v57 = vld [vmem:[#allocation3 + $0x68] sm:$0xff] }
 0x157   : > { %v1725_v48 = vpop.eup %1724  ;;  %1744 = vpow2.f32 %v965_v0  ;;  %v1063_v1 = vsub.f32 %v2130_v13, %v2170_v17  ;;  %v1062_v15 = vsub.f32 %v2122_v9, %v2170_v17 }
 0x158   : > { %973 = vadd.xlane.f32.xlu1 %v1721_v42  ;;  %v1727_v50 = vpop.eup %1726  ;;  %1746 = vpow2.f32 %v963_v4  ;;  %v1090_v40 = vmul.f32 1.442695, %v1061_v3  ;;  %v1088_v41 = vmul.f32 1.442695, %v1060_v5  ;;  %v903_v4 = vld [vmem:[#allocation3 + $0x8] sm:$0xff]  ;;  %v917_v3 = vld [vmem:[#allocation3 + $0x78] sm:$0xff] }
 0x159   : > { %969 = vadd.xlane.f32.xlu0 %v1723_v43  ;;  %v1729_v60 = vpop.eup %1728  ;;  %1748 = vpow2.f32 %v1066_v14  ;;  %v1094_v44 = vmul.f32 1.442695, %v1063_v1  ;;  %v1092_v11 = vmul.f32 1.442695, %v1062_v15  ;;  %v1033_v1 = vld [vmem:[#allocation5 + $0x8] sm:$0xff] }
 0x15a   : > { %v1731_v62 = vpop.eup %1730  ;;  %1750 = vpow2.f32 %v1064_v16  ;;  %v906_v16 = vld [vmem:[#allocation3 + $0x20] sm:$0xff] }
 0x15b   : > { %v1733_v10 = vpop.eup %1732  ;;  %1752 = vpow2.f32 %v1070_v20 }
 0x15c   : > { %977 = vadd.xlane.f32.xlu1 %v1725_v48  ;;  %v1735_v12 = vpop.eup %1734  ;;  %1754 = vpow2.f32 %v1068_v21  ;;  %v908_v21 = vld [vmem:[#allocation3 + $0x30] sm:$0xff] }
 0x15d   : > { %975 = vadd.xlane.f32.xlu0 %v1727_v50  ;;  %v1737_v18 = vpop.eup %1736  ;;  %1756 = vpow2.f32 %v1074_v24 }
 0x15e   : > { %v1739_v19 = vpop.eup %1738  ;;  %1758 = vpow2.f32 %v1072_v25  ;;  %v910_v25 = vld [vmem:[#allocation3 + $0x40] sm:$0xff] }
 0x15f   : > { %v1741_v22 = vpop.eup %1740  ;;  %1760 = vpow2.f32 %v1078_v28 }
 0x160   : > { %981 = vadd.xlane.f32.xlu1 %v1729_v60  ;;  %v1743_v23 = vpop.eup %1742  ;;  %1762 = vpow2.f32 %v1076_v29  ;;  %v912_v29 = vld [vmem:[#allocation3 + $0x50] sm:$0xff] }
 0x161   : > { %979 = vadd.xlane.f32.xlu0 %v1731_v62  ;;  %v1745_v26 = vpop.eup %1744  ;;  %1764 = vpow2.f32 %v1082_v32 }
 0x162   : > { %v1747_v27 = vpop.eup %1746  ;;  %1766 = vpow2.f32 %v1080_v33  ;;  %v914_v33 = vld [vmem:[#allocation3 + $0x60] sm:$0xff] }
 0x163   : > { %v1749_v30 = vpop.eup %1748  ;;  %1768 = vpow2.f32 %v1086_v36 }
 0x164   : > { %985 = vadd.xlane.f32.xlu1 %v1733_v10  ;;  %v1751_v31 = vpop.eup %1750  ;;  %1770 = vpow2.f32 %v1084_v37  ;;  %v916_v37 = vld [vmem:[#allocation3 + $0x70] sm:$0xff] }
 0x165   : > { %983 = vadd.xlane.f32.xlu0 %v1735_v12  ;;  %v1753_v34 = vpop.eup %1752  ;;  %1772 = vpow2.f32 %v1090_v40 }
 0x166   : > { %v1755_v35 = vpop.eup %1754  ;;  %1774 = vpow2.f32 %v1088_v41  ;;  %v1032_v41 = vld [vmem:[#allocation5] sm:$0xff] }
 0x167   : > { %v1757_v38 = vpop.eup %1756  ;;  %1776 = vpow2.f32 %v1094_v44 }
 0x168   : > { %989 = vadd.xlane.f32.xlu1 %v1737_v18  ;;  %v1759_v39 = vpop.eup %1758  ;;  %1778 = vpow2.f32 %v1092_v11  ;;  %v1035_v11 = vld [vmem:[#allocation5 + $0x18] sm:$0xff] }
 0x169   : > { %987 = vadd.xlane.f32.xlu0 %v1739_v19  ;;  %v1761_v42 = vpop.eup %1760 }
 0x16a   : > { %v1763_v43 = vpop.eup %1762 }
 0x16b   : > { %v1765_v45 = vpop.eup %1764 }
 0x16c   : > { %993 = vadd.xlane.f32.xlu1 %v1741_v22  ;;  %v1767_v46 = vpop.eup %1766 }
 0x16d   : > { %991 = vadd.xlane.f32.xlu0 %v1743_v23  ;;  %v1769_v13 = vpop.eup %1768 }
 0x16e   : > { %v1771_v47 = vpop.eup %1770 }
 0x16f   : > { %v1773_v48 = vpop.eup %1772 }
 0x170   : > { %997 = vadd.xlane.f32.xlu1 %v1745_v26  ;;  %v1775_v9 = vpop.eup %1774 }
 0x171   : > { %995 = vadd.xlane.f32.xlu0 %v1747_v27  ;;  %v1777_v50 = vpop.eup %1776 }
 0x172   : > { %v1779_v52 = vpop.eup %1778 }
 0x174   : > { %1098 = vadd.xlane.f32.xlu1 %v1749_v30 }
 0x175   : > { %1096 = vadd.xlane.f32.xlu0 %v1751_v31 }
 0x178   : > { %1102 = vadd.xlane.f32.xlu1 %v1753_v34 }
 0x179   : > { %1100 = vadd.xlane.f32.xlu0 %v1755_v35 }
 0x17c   : > { %1106 = vadd.xlane.f32.xlu1 %v1757_v38 }
 0x17d   : > { %1104 = vadd.xlane.f32.xlu0 %v1759_v39 }
 0x180   : > { %1110 = vadd.xlane.f32.xlu1 %v1761_v42 }
 0x181   : > { %1108 = vadd.xlane.f32.xlu0 %v1763_v43 }
 0x184   : > { %1114 = vadd.xlane.f32.xlu1 %v1765_v45  ;;  %v1034_v45 = vld [vmem:[#allocation5 + $0x10] sm:$0xff] }
 0x185   : > { %1112 = vadd.xlane.f32.xlu0 %v1767_v46 }
 0x188   : > { %1118 = vadd.xlane.f32.xlu1 %v1769_v13 }
 0x189   : > { %1116 = vadd.xlane.f32.xlu0 %v1771_v47 }
 0x18c   : > { %1122 = vadd.xlane.f32.xlu1 %v1773_v48 }
 0x18d   : > { %1120 = vadd.xlane.f32.xlu0 %v1775_v9  ;;  %v1037_v9 = vld [vmem:[#allocation5 + $0x28] sm:$0xff] }
 0x190   : > { %1126 = vadd.xlane.f32.xlu1 %v1777_v50  ;;  %v1036_v50 = vld [vmem:[#allocation5 + $0x20] sm:$0xff] }
 0x191   : > { %1124 = vadd.xlane.f32.xlu0 %v1779_v52 }
 0x1e1   : > { %v972_v58 = vpop.xlane.xlu1 %971 }
 0x1e2   : > { %v1001_v60 = vadd.f32 %v972_v58, %v904_v54  ;;  %v968_v62 = vpop.xlane.xlu0 %967 }
 0x1e3   : > { %v999_v0 = vadd.f32 %v968_v62, %v902_v56  ;;  %v1038_v62 = vld [vmem:[#allocation5 + $0x30] sm:$0xff] }
 0x1e4   : > { %1018 = vst.msk [vmem:[#allocation3 + $0x10] sm:$0xff] %vm1015_vm2, %v1001_v60  ;;  %v1039_v60 = vld [vmem:[#allocation5 + $0x38] sm:$0xff] }
 0x1e5   : > { %1016 = vst.msk [vmem:[#allocation3] sm:$0xff] %vm1015_vm2, %v999_v0  ;;  %v974_v6 = vpop.xlane.xlu1 %973 }
 0x1e6   : > { %v1002_v10 = vadd.f32 %v974_v6, %v905_v2  ;;  %v970_v12 = vpop.xlane.xlu0 %969 }
 0x1e7   : > { %v1000_v14 = vadd.f32 %v970_v12, %v903_v4  ;;  %v1040_v12 = vld [vmem:[#allocation5 + $0x40] sm:$0xff] }
 0x1e8   : > { %1019 = vst.msk [vmem:[#allocation3 + $0x18] sm:$0xff] %vm1015_vm2, %v1002_v10  ;;  %v1041_v10 = vld [vmem:[#allocation5 + $0x48] sm:$0xff] }
 0x1e9   : > { %1017 = vst.msk [vmem:[#allocation3 + $0x8] sm:$0xff] %vm1015_vm2, %v1000_v14  ;;  %v978_v55 = vpop.xlane.xlu1 %977 }
 0x1ea   : > { %v1004_v18 = vadd.f32 %v978_v55, %v907_v8  ;;  %v976_v19 = vpop.xlane.xlu0 %975 }
 0x1eb   : > { %v1003_v20 = vadd.f32 %v976_v19, %v906_v16  ;;  %v1042_v19 = vld [vmem:[#allocation5 + $0x50] sm:$0xff] }
 0x1ec   : > { %1021 = vst.msk [vmem:[#allocation3 + $0x28] sm:$0xff] %vm1015_vm2, %v1004_v18  ;;  %v1043_v18 = vld [vmem:[#allocation5 + $0x58] sm:$0xff] }
 0x1ed   : > { %1020 = vst.msk [vmem:[#allocation3 + $0x20] sm:$0xff] %vm1015_vm2, %v1003_v20  ;;  %v982_v53 = vpop.xlane.xlu1 %981 }
 0x1ee   : > { %v1006_v22 = vadd.f32 %v982_v53, %v909_v51  ;;  %v980_v23 = vpop.xlane.xlu0 %979 }
 0x1ef   : > { %v1005_v24 = vadd.f32 %v980_v23, %v908_v21  ;;  %v1044_v23 = vld [vmem:[#allocation5 + $0x60] sm:$0xff] }
 0x1f0   : > { %1023 = vst.msk [vmem:[#allocation3 + $0x38] sm:$0xff] %vm1015_vm2, %v1006_v22  ;;  %v1045_v22 = vld [vmem:[#allocation5 + $0x68] sm:$0xff] }
 0x1f1   : > { %1022 = vst.msk [vmem:[#allocation3 + $0x30] sm:$0xff] %vm1015_vm2, %v1005_v24  ;;  %v986_v63 = vpop.xlane.xlu1 %985 }
 0x1f2   : > { %v1008_v26 = vadd.f32 %v986_v63, %v911_v49  ;;  %v984_v27 = vpop.xlane.xlu0 %983 }
 0x1f3   : > { %v1007_v28 = vadd.f32 %v984_v27, %v910_v25  ;;  %v1046_v27 = vld [vmem:[#allocation5 + $0x70] sm:$0xff] }
 0x1f4   : > { %1025 = vst.msk [vmem:[#allocation3 + $0x48] sm:$0xff] %vm1015_vm2, %v1008_v26  ;;  %v1047_v26 = vld [vmem:[#allocation5 + $0x78] sm:$0xff] }
 0x1f5   : > { %1024 = vst.msk [vmem:[#allocation3 + $0x40] sm:$0xff] %vm1015_vm2, %v1007_v28  ;;  %v990_v61 = vpop.xlane.xlu1 %989 }
 0x1f6   : > { %v1010_v30 = vadd.f32 %v990_v61, %v913_v59  ;;  %v988_v31 = vpop.xlane.xlu0 %987 }
 0x1f7   : > { %v1009_v32 = vadd.f32 %v988_v31, %v912_v29  ;;  %v1165_v31 = vld [vmem:[#allocation3 + $0x8] sm:$0xff] (!%p1528_p8) }
 0x1f8   : > { %1027 = vst.msk [vmem:[#allocation3 + $0x58] sm:$0xff] %vm1015_vm2, %v1010_v30  ;;  %v1164_v30 = vld [vmem:[#allocation3] sm:$0xff] (!%p1528_p8) }
 0x1f9   : > { %1026 = vst.msk [vmem:[#allocation3 + $0x50] sm:$0xff] %vm1015_vm2, %v1009_v32  ;;  %v994_v7 = vpop.xlane.xlu1 %993  ;;  %v1166_v32 = vld [vmem:[#allocation3 + $0x10] sm:$0xff] (!%p1528_p8)  ;;  %1780 = vlog2.f32 (!%p1528_p8), %v1164_v30 }
 0x1fa   : > { %v1012_v34 = vadd.f32 %v994_v7, %v915_v57  ;;  %v992_v35 = vpop.xlane.xlu0 %991  ;;  %v1167_v57 = vld [vmem:[#allocation3 + $0x18] sm:$0xff] (!%p1528_p8)  ;;  %1782 = vlog2.f32 (!%p1528_p8), %v1165_v31  ;;  %v1169_v7 = vld [vmem:[#allocation3 + $0x28] sm:$0xff] (!%p1528_p8) }
 0x1fb   : > { %v1011_v36 = vadd.f32 %v992_v35, %v914_v33  ;;  %v1168_v33 = vld [vmem:[#allocation3 + $0x20] sm:$0xff] (!%p1528_p8)  ;;  %1784 = vlog2.f32 (!%p1528_p8), %v1166_v32  ;;  %v1171_v35 = vld [vmem:[#allocation3 + $0x38] sm:$0xff] (!%p1528_p8) }
 0x1fc   : > { %1029 = vst.msk [vmem:[#allocation3 + $0x68] sm:$0xff] %vm1015_vm2, %v1012_v34  ;;  %1786 = vlog2.f32 (!%p1528_p8), %v1167_v57  ;;  %v1170_v34 = vld [vmem:[#allocation3 + $0x30] sm:$0xff] (!%p1528_p8) }
 0x1fd   : > { %1028 = vst.msk [vmem:[#allocation3 + $0x60] sm:$0xff] %vm1015_vm2, %v1011_v36  ;;  %v998_v5 = vpop.xlane.xlu1 %997  ;;  %1788 = vlog2.f32 (!%p1528_p8), %v1168_v33  ;;  %v1172_v36 = vld [vmem:[#allocation3 + $0x40] sm:$0xff] (!%p1528_p8) }
 0x1fe   : > { %v1014_v38 = vadd.f32 %v998_v5, %v917_v3  ;;  %v996_v39 = vpop.xlane.xlu0 %995  ;;  %1790 = vlog2.f32 (!%p1528_p8), %v1169_v7  ;;  %v1173_v3 = vld [vmem:[#allocation3 + $0x48] sm:$0xff] (!%p1528_p8) }
 0x1ff   : > { %v1013_v40 = vadd.f32 %v996_v39, %v916_v37  ;;  %1792 = vlog2.f32 (!%p1528_p8), %v1170_v34  ;;  %v1175_v5 = vld [vmem:[#allocation3 + $0x58] sm:$0xff] (!%p1528_p8) }
 0x200   : > { %1031 = vst.msk [vmem:[#allocation3 + $0x78] sm:$0xff] %vm1015_vm2, %v1014_v38  ;;  %1794 = vlog2.f32 (!%p1528_p8), %v1171_v35  ;;  %v1174_v37 = vld [vmem:[#allocation3 + $0x50] sm:$0xff] (!%p1528_p8) }
 0x201   : > { %1030 = vst.msk [vmem:[#allocation3 + $0x70] sm:$0xff] %vm1015_vm2, %v1013_v40  ;;  %v1099_v15 = vpop.xlane.xlu1 %1098  ;;  %1796 = vlog2.f32 (!%p1528_p8), %v1172_v36 }
 0x202   : > { %v1129_v42 = vadd.f32 %v1099_v15, %v1033_v1  ;;  %v1097_v43 = vpop.xlane.xlu0 %1096  ;;  %1798 = vlog2.f32 (!%p1528_p8), %v1173_v3 }
 0x203   : > { %v1128_v44 = vadd.f32 %v1097_v43, %v1032_v41  ;;  %v1781_v39 = vpop.eup (!%p1528_p8), %1780  ;;  %1800 = vlog2.f32 (!%p1528_p8), %v1174_v37  ;;  %v1177_v40 = vld [vmem:[#allocation3 + $0x68] sm:$0xff] (!%p1528_p8) }
 0x204   : > { %1145 = vst.msk [vmem:[#allocation5 + $0x8] sm:$0xff] %vm1015_vm2, %v1129_v42  ;;  %v1176_v38 = vld [vmem:[#allocation3 + $0x60] sm:$0xff] (!%p1528_p8)  ;;  %v1783_v1 = vpop.eup (!%p1528_p8), %1782  ;;  %v1181_v41 = vmul.f32 (!%p1528_p8), 0.6931472, %v1781_v39  ;;  %1802 = vlog2.f32 (!%p1528_p8), %v1175_v5 }
 0x205   : > { %1144 = vst.msk [vmem:[#allocation5] sm:$0xff] %vm1015_vm2, %v1128_v44  ;;  %v1103_v46 = vpop.xlane.xlu1 %1102  ;;  %v1785_v42 = vpop.eup (!%p1528_p8), %1784  ;;  %v1183_v43 = vmul.f32 (!%p1528_p8), 0.6931472, %v1783_v1  ;;  %1804 = vlog2.f32 (!%p1528_p8), %v1176_v38 }
 0x206   : > { %v1131_v13 = vadd.f32 %v1103_v46, %v1035_v11  ;;  %v1101_v47 = vpop.xlane.xlu0 %1100  ;;  %v1787_v11 = vpop.eup (!%p1528_p8), %1786  ;;  %v1185_v46 = vmul.f32 (!%p1528_p8), 0.6931472, %v1785_v42  ;;  %1806 = vlog2.f32 (!%p1528_p8), %v1177_v40 }
 0x207   : > { %v1130_v48 = vadd.f32 %v1101_v47, %v1034_v45  ;;  %v1179_v44 = vld [vmem:[#allocation3 + $0x78] sm:$0xff] (!%p1528_p8)  ;;  %v1212_v45 = vadd.f32 (!%p1528_p8), %v1181_v41, %v2170_v17  ;;  %v1789_v47 = vpop.eup (!%p1528_p8), %1788 }
 0x208   : > { %1147 = vst.msk [vmem:[#allocation5 + $0x18] sm:$0xff] %vm1015_vm2, %v1131_v13  ;;  %v1178_v15 = vld [vmem:[#allocation3 + $0x70] sm:$0xff] (!%p1528_p8) }
 0x209   : > { %1146 = vst.msk [vmem:[#allocation5 + $0x10] sm:$0xff] %vm1015_vm2, %v1130_v48  ;;  %v1107_v52 = vpop.xlane.xlu1 %1106  ;;  %v1213_v48 = vadd.f32 (!%p1528_p8), %v1183_v43, %v2170_v17  ;;  %1808 = vlog2.f32 (!%p1528_p8), %v1178_v15  ;;  %1228 = vst.msk [vmem:[%s1977_s17] sm:$0xff] (!%p1528_p8), %vm1015_vm2, %v1212_v45 }
 0x20a   : > { %v1133_v54 = vadd.f32 %v1107_v52, %v1037_v9  ;;  %v1105_v56 = vpop.xlane.xlu0 %1104  ;;  %v1187_v9 = vmul.f32 (!%p1528_p8), 0.6931472, %v1787_v11  ;;  %v1791_v52 = vpop.eup (!%p1528_p8), %1790  ;;  %1810 = vlog2.f32 (!%p1528_p8), %v1179_v44 }
 0x20b   : > { %v1132_v58 = vadd.f32 %v1105_v56, %v1036_v50  ;;  %v1245_v50 = vld [vmem:[#allocation5 + $0x8] sm:$0xff] (!%p1528_p8)  ;;  %v1189_v56 = vmul.f32 (!%p1528_p8), 0.6931472, %v1789_v47  ;;  %1229 = vst.msk [vmem:[%s1977_s17 + $0x8] sm:$0xff] (!%p1528_p8), %vm1015_vm2, %v1213_v48 }
 0x20c   : > { %1149 = vst.msk [vmem:[#allocation5 + $0x28] sm:$0xff] %vm1015_vm2, %v1133_v54  ;;  %v1244_v13 = vld [vmem:[#allocation5] sm:$0xff] (!%p1528_p8)  ;;  %v1214_v54 = vadd.f32 (!%p1528_p8), %v1185_v46, %v2170_v17 }
 0x20d   : > { %1148 = vst.msk [vmem:[#allocation5 + $0x20] sm:$0xff] %vm1015_vm2, %v1132_v58  ;;  %v1111_v0 = vpop.xlane.xlu1 %1110  ;;  %1812 = vlog2.f32 (!%p1528_p8), %v1244_v13 }
 0x20e   : > { %v1135_v2 = vadd.f32 %v1111_v0, %v1039_v60  ;;  %v1109_v4 = vpop.xlane.xlu0 %1108  ;;  %v1793_v60 = vpop.eup (!%p1528_p8), %1792  ;;  %v1191_v0 = vmul.f32 (!%p1528_p8), 0.6931472, %v1791_v52  ;;  %1230 = vst.msk [vmem:[%s1977_s17 + $0x10] sm:$0xff] (!%p1528_p8), %vm1015_vm2, %v1214_v54  ;;  %1814 = vlog2.f32 (!%p1528_p8), %v1245_v50 }
 0x20f   : > { %v1134_v6 = vadd.f32 %v1109_v4, %v1038_v62  ;;  %v1215_v62 = vadd.f32 (!%p1528_p8), %v1187_v9, %v2170_v17  ;;  %v1795_v4 = vpop.eup (!%p1528_p8), %1794 }
 0x210   : > { %1151 = vst.msk [vmem:[#allocation5 + $0x38] sm:$0xff] %vm1015_vm2, %v1135_v2  ;;  %v1246_v58 = vld [vmem:[#allocation5 + $0x10] sm:$0xff] (!%p1528_p8)  ;;  %v1247_v2 = vld [vmem:[#allocation5 + $0x18] sm:$0xff] (!%p1528_p8) }
 0x211   : > { %1150 = vst.msk [vmem:[#allocation5 + $0x30] sm:$0xff] %vm1015_vm2, %v1134_v6  ;;  %v1115_v14 = vpop.xlane.xlu1 %1114  ;;  %v1216_v6 = vadd.f32 (!%p1528_p8), %v1189_v56, %v2170_v17  ;;  %1231 = vst.msk [vmem:[%s1977_s17 + $0x18] sm:$0xff] (!%p1528_p8), %vm1015_vm2, %v1215_v62  ;;  %1816 = vlog2.f32 (!%p1528_p8), %v1246_v58 }
 0x212   : > { %v1137_v8 = vadd.f32 %v1115_v14, %v1041_v10  ;;  %v1113_v16 = vpop.xlane.xlu0 %1112  ;;  %v1193_v10 = vmul.f32 (!%p1528_p8), 0.6931472, %v1793_v60  ;;  %v1797_v14 = vpop.eup (!%p1528_p8), %1796  ;;  %1818 = vlog2.f32 (!%p1528_p8), %v1247_v2 }
 0x213   : > { %v1136_v55 = vadd.f32 %v1113_v16, %v1040_v12  ;;  %v1195_v16 = vmul.f32 (!%p1528_p8), 0.6931472, %v1795_v4  ;;  %1232 = vst.msk [vmem:[%s1977_s17 + $0x20] sm:$0xff] (!%p1528_p8), %vm1015_vm2, %v1216_v6 }
 0x214   : > { %1153 = vst.msk [vmem:[#allocation5 + $0x48] sm:$0xff] %vm1015_vm2, %v1137_v8  ;;  %v1248_v12 = vld [vmem:[#allocation5 + $0x20] sm:$0xff] (!%p1528_p8)  ;;  %v1217_v8 = vadd.f32 (!%p1528_p8), %v1191_v0, %v2170_v17 }
 0x215   : > { %1152 = vst.msk [vmem:[#allocation5 + $0x40] sm:$0xff] %vm1015_vm2, %v1136_v55  ;;  %v1119_v20 = vpop.xlane.xlu1 %1118  ;;  %v1249_v55 = vld [vmem:[#allocation5 + $0x28] sm:$0xff] (!%p1528_p8)  ;;  %1820 = vlog2.f32 (!%p1528_p8), %v1248_v12 }
 0x216   : > { %v1139_v51 = vadd.f32 %v1119_v20, %v1043_v18  ;;  %v1117_v21 = vpop.xlane.xlu0 %1116  ;;  %v1799_v18 = vpop.eup (!%p1528_p8), %1798  ;;  %v1197_v20 = vmul.f32 (!%p1528_p8), 0.6931472, %v1797_v14  ;;  %1233 = vst.msk [vmem:[%s1977_s17 + $0x28] sm:$0xff] (!%p1528_p8), %vm1015_vm2, %v1217_v8  ;;  %1822 = vlog2.f32 (!%p1528_p8), %v1249_v55 }
 0x217   : > { %v1138_v53 = vadd.f32 %v1117_v21, %v1042_v19  ;;  %v1218_v19 = vadd.f32 (!%p1528_p8), %v1193_v10, %v2170_v17  ;;  %v1801_v21 = vpop.eup (!%p1528_p8), %1800 }
 0x218   : > { %1155 = vst.msk [vmem:[#allocation5 + $0x58] sm:$0xff] %vm1015_vm2, %v1139_v51  ;;  %v1250_v51 = vld [vmem:[#allocation5 + $0x30] sm:$0xff] (!%p1528_p8) }
 0x219   : > { %1154 = vst.msk [vmem:[#allocation5 + $0x50] sm:$0xff] %vm1015_vm2, %v1138_v53  ;;  %v1123_v24 = vpop.xlane.xlu1 %1122  ;;  %v1219_v53 = vadd.f32 (!%p1528_p8), %v1195_v16, %v2170_v17  ;;  %1234 = vst.msk [vmem:[%s1977_s17 + $0x30] sm:$0xff] (!%p1528_p8), %vm1015_vm2, %v1218_v19  ;;  %1824 = vlog2.f32 (!%p1528_p8), %v1250_v51 }
 0x21a   : > { %v1141_v49 = vadd.f32 %v1123_v24, %v1045_v22  ;;  %v1121_v25 = vpop.xlane.xlu0 %1120  ;;  %v1199_v22 = vmul.f32 (!%p1528_p8), 0.6931472, %v1799_v18  ;;  %v1803_v24 = vpop.eup (!%p1528_p8), %1802 }
 0x21b   : > { %v1140_v63 = vadd.f32 %v1121_v25, %v1044_v23  ;;  %1163 = sbr.rel (%p1528_p8) target bundleno = 570 (0x23a), region = 48  ;;  %v1251_v23 = vld [vmem:[#allocation5 + $0x38] sm:$0xff] (!%p1528_p8)  ;;  %v1201_v25 = vmul.f32 (!%p1528_p8), 0.6931472, %v1801_v21  ;;  %1235 = vst.msk [vmem:[%s1977_s17 + $0x38] sm:$0xff] (!%p1528_p8), %vm1015_vm2, %v1219_v53 }
 0x21c   : > { %1157 = vst.msk [vmem:[#allocation5 + $0x68] sm:$0xff] %vm1015_vm2, %v1141_v49  ;;  %v1220_v49 = vadd.f32 (!%p1528_p8), %v1197_v20, %v2170_v17  ;;  %1826 = vlog2.f32 (!%p1528_p8), %v1251_v23 }
 0x21d   : > { %1156 = vst.msk [vmem:[#allocation5 + $0x60] sm:$0xff] %vm1015_vm2, %v1140_v63  ;;  %v1127_v28 = vpop.xlane.xlu1 %1126  ;;  %v1252_v63 = vld [vmem:[#allocation5 + $0x40] sm:$0xff] (!%p1528_p8) }
 0x21e   : > { %v1143_v59 = vadd.f32 %v1127_v28, %v1047_v26  ;;  %v1125_v29 = vpop.xlane.xlu0 %1124  ;;  %v1805_v26 = vpop.eup (!%p1528_p8), %1804  ;;  %v1203_v28 = vmul.f32 (!%p1528_p8), 0.6931472, %v1803_v24  ;;  %1236 = vst.msk [vmem:[%s1977_s17 + $0x40] sm:$0xff] (!%p1528_p8), %vm1015_vm2, %v1220_v49  ;;  %1828 = vlog2.f32 (!%p1528_p8), %v1252_v63 }
 0x21f   : > { %v1142_v61 = vadd.f32 %v1125_v29, %v1046_v27  ;;  %v1221_v27 = vadd.f32 (!%p1528_p8), %v1199_v22, %v2170_v17  ;;  %v1807_v29 = vpop.eup (!%p1528_p8), %1806  ;;  %v1205_v30 = vmul.f32 (!%p1528_p8), 0.6931472, %v1805_v26  ;;  %v1255_v7 = vld [vmem:[#allocation5 + $0x58] sm:$0xff] (!%p1528_p8) }
 0x220   : > { %1159 = vst.msk [vmem:[#allocation5 + $0x78] sm:$0xff] %vm1015_vm2, %v1143_v59  ;;  %v1253_v59 = vld [vmem:[#allocation5 + $0x48] sm:$0xff] (!%p1528_p8)  ;;  %v1254_v31 = vld [vmem:[#allocation5 + $0x50] sm:$0xff] (!%p1528_p8)  ;;  %v1809_v32 = vpop.eup (!%p1528_p8), %1808  ;;  %v1223_v57 = vadd.f32 (!%p1528_p8), %v1203_v28, %v2170_v17  ;;  %v1207_v33 = vmul.f32 (!%p1528_p8), 0.6931472, %v1807_v29 }
 0x221   : > { %1158 = vst.msk [vmem:[#allocation5 + $0x70] sm:$0xff] %vm1015_vm2, %v1142_v61  ;;  %v1222_v61 = vadd.f32 (!%p1528_p8), %v1201_v25, %v2170_v17  ;;  %1237 = vst.msk [vmem:[%s1977_s17 + $0x48] sm:$0xff] (!%p1528_p8), %vm1015_vm2, %v1221_v27  ;;  %v1811_v34 = vpop.eup (!%p1528_p8), %1810  ;;  %v1224_v35 = vadd.f32 (!%p1528_p8), %v1205_v30, %v2170_v17  ;;  %v1209_v36 = vmul.f32 (!%p1528_p8), 0.6931472, %v1809_v32  ;;  %1830 = vlog2.f32 (!%p1528_p8), %v1253_v59 }
 0x222   : > { %v1813_v37 = vpop.eup %1812  ;;  %1239 = vst.msk [vmem:[%s1977_s17 + $0x58] sm:$0xff] %vm1015_vm2, %v1223_v57  ;;  %v1225_v5 = vadd.f32 %v1207_v33, %v2170_v17  ;;  %v1211_v38 = vmul.f32 0.6931472, %v1811_v34  ;;  %1832 = vlog2.f32 %v1254_v31 }
 0x223   : > { %1238 = vst.msk [vmem:[%s1977_s17 + $0x50] sm:$0xff] %vm1015_vm2, %v1222_v61  ;;  %v1257_v39 = vld [vmem:[#allocation5 + $0x68] sm:$0xff]  ;;  %v1815_v40 = vpop.eup %1814  ;;  %1240 = vst.msk [vmem:[%s1977_s17 + $0x60] sm:$0xff] %vm1015_vm2, %v1224_v35  ;;  %v1226_v1 = vadd.f32 %v1209_v36, %v2170_v17  ;;  %v1261_v41 = vmul.f32 0.6931472, %v1813_v37  ;;  %1834 = vlog2.f32 %v1255_v7 }
 0x224   : > { %v1256_v3 = vld [vmem:[#allocation5 + $0x60] sm:$0xff]  ;;  %v1817_v42 = vpop.eup %1816  ;;  %1241 = vst.msk [vmem:[%s1977_s17 + $0x68] sm:$0xff] %vm1015_vm2, %v1225_v5  ;;  %v1227_v43 = vadd.f32 %v1211_v38, %v2170_v17  ;;  %v1263_v44 = vmul.f32 0.6931472, %v1815_v40 }
 0x225   : > { %1836 = vlog2.f32 %v1256_v3  ;;  %v1819_v45 = vpop.eup %1818  ;;  %1242 = vst.msk [vmem:[%s1977_s17 + $0x70] sm:$0xff] %vm1015_vm2, %v1226_v1  ;;  %v1292_v46 = vadd.f32 %v1261_v41, %v2170_v17  ;;  %v1265_v13 = vmul.f32 0.6931472, %v1817_v42 }
 0x226   : > { %1838 = vlog2.f32 %v1257_v39  ;;  %v1821_v47 = vpop.eup %1820  ;;  %1243 = vst.msk [vmem:[%s1977_s17 + $0x78] sm:$0xff] %vm1015_vm2, %v1227_v43  ;;  %v1293_v48 = vadd.f32 %v1263_v44, %v2170_v17  ;;  %v1267_v9 = vmul.f32 0.6931472, %v1819_v45 }
 0x227   : > { %v1259_v11 = vld [vmem:[#allocation5 + $0x78] sm:$0xff]  ;;  %v1823_v50 = vpop.eup %1822  ;;  %1308 = vst.msk [vmem:[%s1982_s20] sm:$0xff] %vm1015_vm2, %v1292_v46  ;;  %v1294_v52 = vadd.f32 %v1265_v13, %v2170_v17  ;;  %v1269_v54 = vmul.f32 0.6931472, %v1821_v47 }
 0x228   : > { %v1258_v15 = vld [vmem:[#allocation5 + $0x70] sm:$0xff]  ;;  %v1825_v56 = vpop.eup %1824  ;;  %1309 = vst.msk [vmem:[%s1982_s20 + $0x8] sm:$0xff] %vm1015_vm2, %v1293_v48  ;;  %v1295_v58 = vadd.f32 %v1267_v9, %v2170_v17  ;;  %v1271_v60 = vmul.f32 0.6931472, %v1823_v50 }
 0x229   : > { %1840 = vlog2.f32 %v1258_v15  ;;  %v1827_v62 = vpop.eup %1826  ;;  %1310 = vst.msk [vmem:[%s1982_s20 + $0x10] sm:$0xff] %vm1015_vm2, %v1294_v52  ;;  %v1296_v0 = vadd.f32 %v1269_v54, %v2170_v17  ;;  %v1273_v2 = vmul.f32 0.6931472, %v1825_v56 }
 0x22a   : > { %1842 = vlog2.f32 %v1259_v11  ;;  %v1829_v4 = vpop.eup %1828  ;;  %1311 = vst.msk [vmem:[%s1982_s20 + $0x18] sm:$0xff] %vm1015_vm2, %v1295_v58  ;;  %v1297_v6 = vadd.f32 %v1271_v60, %v2170_v17  ;;  %v1275_v10 = vmul.f32 0.6931472, %v1827_v62 }
 0x22b   : > { %v1831_v12 = vpop.eup %1830  ;;  %1312 = vst.msk [vmem:[%s1982_s20 + $0x20] sm:$0xff] %vm1015_vm2, %v1296_v0  ;;  %v1298_v14 = vadd.f32 %v1273_v2, %v2170_v17  ;;  %v1277_v8 = vmul.f32 0.6931472, %v1829_v4 }
 0x22c   : > { %v1833_v16 = vpop.eup %1832  ;;  %1313 = vst.msk [vmem:[%s1982_s20 + $0x28] sm:$0xff] %vm1015_vm2, %v1297_v6  ;;  %v1299_v55 = vadd.f32 %v1275_v10, %v2170_v17  ;;  %v1279_v18 = vmul.f32 0.6931472, %v1831_v12 }
 0x22d   : > { %v1835_v19 = vpop.eup %1834  ;;  %1314 = vst.msk [vmem:[%s1982_s20 + $0x30] sm:$0xff] %vm1015_vm2, %v1298_v14  ;;  %v1300_v20 = vadd.f32 %v1277_v8, %v2170_v17  ;;  %v1281_v51 = vmul.f32 0.6931472, %v1833_v16 }
 0x22e   : > { %1315 = vst.msk [vmem:[%s1982_s20 + $0x38] sm:$0xff] %vm1015_vm2, %v1299_v55  ;;  %v1301_v53 = vadd.f32 %v1279_v18, %v2170_v17  ;;  %v1283_v22 = vmul.f32 0.6931472, %v1835_v19 }
 0x22f   : > { %v1837_v21 = vpop.eup %1836  ;;  %1316 = vst.msk [vmem:[%s1982_s20 + $0x40] sm:$0xff] %vm1015_vm2, %v1300_v20  ;;  %v1302_v24 = vadd.f32 %v1281_v51, %v2170_v17 }
 0x230   : > { %v1839_v23 = vpop.eup %1838  ;;  %v1285_v49 = vmul.f32 0.6931472, %v1837_v21  ;;  %1317 = vst.msk [vmem:[%s1982_s20 + $0x48] sm:$0xff] %vm1015_vm2, %v1301_v53  ;;  %v1303_v63 = vadd.f32 %v1283_v22, %v2170_v17 }
 0x231   : > { %v1287_v26 = vmul.f32 0.6931472, %v1839_v23  ;;  %1318 = vst.msk [vmem:[%s1982_s20 + $0x50] sm:$0xff] %vm1015_vm2, %v1302_v24 }
 0x232   : > { %v1304_v28 = vadd.f32 %v1285_v49, %v2170_v17  ;;  %1319 = vst.msk [vmem:[%s1982_s20 + $0x58] sm:$0xff] %vm1015_vm2, %v1303_v63 }
 0x233   : > { %v1841_v25 = vpop.eup %1840  ;;  %v1305_v29 = vadd.f32 %v1287_v26, %v2170_v17 }
 0x234   : > { %v1843_v27 = vpop.eup %1842  ;;  %v1289_v59 = vmul.f32 0.6931472, %v1841_v25  ;;  %1320 = vst.msk [vmem:[%s1982_s20 + $0x60] sm:$0xff] %vm1015_vm2, %v1304_v28 }
 0x235   : > { %v1291_v61 = vmul.f32 0.6931472, %v1843_v27  ;;  %1321 = vst.msk [vmem:[%s1982_s20 + $0x68] sm:$0xff] %vm1015_vm2, %v1305_v29 }
 0x236   : > { %v1306_v30 = vadd.f32 %v1289_v59, %v2170_v17 }
 0x237   : > { %v1307_v31 = vadd.f32 %v1291_v61, %v2170_v17 }
 0x238   : > { %1322 = vst.msk [vmem:[%s1982_s20 + $0x70] sm:$0xff] %vm1015_vm2, %v1306_v30 }
 0x239   : > { %1323 = vst.msk [vmem:[%s1982_s20 + $0x78] sm:$0xff] %vm1015_vm2, %v1307_v31 }
 0x23a PF: > { %s18_s27 = sadd.s32 1, %s1882_s27   ;;  %s2387_s23 = smov %s1874_s25 }
 0x23b   : > { %p15_p9 = scmp.ge.s32.totalorder %s18_s27, 6   ;;  %s2388_s24 = smov %s1878_s26 }
 0x23c   : > { %s2389_s25 = smov %s2392_s0  ;;  %s2390_s26 = smov %s2396_s28 }
 0x23d   :  { %17 = sbr.rel (!%p15_p9) target bundleno = 3 (0x3), region = 99 }

</bundles_post_ra>
